<compile_context>
chip_gen: v6e
topology: v6e:2x2x1
jax: 0.10.0
libtpu: 0.0.40
codegen_flags: <defaults>
</compile_context>

<pallas_src>
import functools

import jax
import jax.numpy as jnp
from jax.experimental import pallas as pl
from jax.experimental.pallas import tpu as pltpu

EDGE_WEIGHT = 0.5
_LANE = 128


def _round_up(x, m):
    return -(-x // m) * m


def _crossgnn_kernel(tgt_ref, adj_ref, w_ref, o_ref, *scratch,
                     t_k, n_valid, mask_k, cache_support, acc_in_out):
    """One grid step: o[b, i] += adj[b, i-block, k-block] @ (tgt[b, k-block] @ W).

    Block views (batch dim squeezed away by the BlockSpecs):
      tgt_ref: (t_k, F_in)   adj_ref: (t_i, t_k)   w_ref: (F_in, F_out)
      o_ref:   (t_i, F_out)  -- resident across the k axis (constant block idx).
    Scratch (layout decided statically in the wrapper):
      [support cache (n_p, F_out) f32]  iff cache_support
      [accumulator  (t_i, F_out) f32]   iff not acc_in_out
    """
    idx = 0
    if cache_support:
        sup_cache_ref = scratch[idx]
        idx += 1
    acc_ref = o_ref if acc_in_out else scratch[idx]

    i = pl.program_id(1)
    k = pl.program_id(2)

    # ---- support block (tgt_block @ W): computed once per (b, k) ------------
    if cache_support:
        off = pl.multiple_of(k * t_k, t_k)

        @pl.when(i == 0)
        def _fill_support_cache():
            sup_cache_ref[pl.ds(off, t_k), :] = jnp.dot(
                tgt_ref[...], w_ref[...], preferred_element_type=jnp.float32)

        sup_blk = sup_cache_ref[pl.ds(off, t_k), :]
    else:
        sup_blk = jnp.dot(tgt_ref[...], w_ref[...],
                          preferred_element_type=jnp.float32)

    # ---- ragged last reduction tile: zero the OOB adj columns ---------------
    # (OOB VMEM contents are garbage and may be NaN; a select, not a multiply.)
    adj_blk = adj_ref[...]
    if mask_k:
        col = jax.lax.broadcasted_iota(jnp.int32, adj_blk.shape, 1) + k * t_k
        adj_blk = jnp.where(col < n_valid, adj_blk, jnp.zeros_like(adj_blk))

    # ---- accumulate adj_tile @ support over the reduction axis --------------
    @pl.when(k == 0)
    def _init():
        acc_ref[...] = jnp.zeros_like(acc_ref)

    acc_ref[...] += jnp.dot(adj_blk, sup_blk,
                            preferred_element_type=jnp.float32)

    if not acc_in_out:
        @pl.when(k == pl.num_programs(2) - 1)
        def _finalize():
            o_ref[...] = acc_ref[...].astype(o_ref.dtype)


def cross_gnn(tgt, adj, weight, edge_weight=EDGE_WEIGHT, *,
              row_tile=512, k_tile=1024,
              support_cache_limit_bytes=4 * 1024 * 1024):
    """CrossGNN forward: (adj * edge_weight) @ (tgt @ weight).

    tgt: [B, N, F_in], adj: [B, N, N], weight: [F_in, F_out] -> [B, N, F_out].
    """
    B, N, F_in = tgt.shape
    assert adj.shape == (B, N, N), adj.shape
    assert weight.shape[0] == F_in, (weight.shape, F_in)
    F_out = weight.shape[1]
    out_dtype = tgt.dtype

    # edge_weight commutes through both matmuls: fold it into the tiny weight
    # matrix instead of scaling adj (O(N^2)) or the output (O(N*F_out)).
    w = weight * jnp.asarray(edge_weight, dtype=weight.dtype)

    # ---- node-axis handling ---------------------------------------------------
    # Tiny graphs: pad the node axis up to one lane-dense 128 tile (a few KiB of
    # zeros -> unmasked stores, full MXU K).  Large graphs: never pad adj; ragged
    # row tiles = dropped OOB writes, ragged reduction tiles = in-kernel mask.
    if N < _LANE:
        n_node = _LANE
        tgt = jnp.pad(tgt, ((0, 0), (0, n_node - N), (0, 0)))
        adj = jnp.pad(adj, ((0, 0), (0, n_node - N), (0, n_node - N)))
    else:
        n_node = N

    t_i = min(row_tile, n_node)         # adj row tile (multiple of 128, or full dim)
    t_k = min(k_tile, n_node)           # adj col / reduction tile
    n_p = _round_up(n_node, t_k)        # padded support / tgt row count
    if tgt.shape[1] != n_p:
        # Cheap O(N*F_in) zero pad so support rows >= N are exact zeros.
        tgt = jnp.pad(tgt, ((0, 0), (0, n_p - tgt.shape[1]), (0, 0)))
    mask_k = n_p != n_node              # last k tile reads OOB adj columns

    num_i = pl.cdiv(n_node, t_i)
    num_k = n_p // t_k
    grid = (B, num_i, num_k)

    # support for a fixed (b, k) is identical for every row tile i: cache it in
    # VMEM during the i == 0 sweep (and stop re-DMAing tgt) whenever it fits.
    cache_support = num_i > 1 and n_p * F_out * 4 <= support_cache_limit_bytes
    acc_in_out = out_dtype == jnp.float32   # accumulate straight into o_ref

    if cache_support:
        # For i > 0 the tgt block is unused: pin its index so it is not re-DMA'd.
        tgt_index = lambda b, i, k: (b, jnp.where(i == 0, k, 0), 0)
    else:
        tgt_index = lambda b, i, k: (b, k, 0)

    scratch_shapes = []
    if cache_support:
        scratch_shapes.append(pltpu.VMEM((n_p, F_out), jnp.float32))
    if not acc_in_out:
        scratch_shapes.append(pltpu.VMEM((t_i, F_out), jnp.float32))

    # VMEM budget: double-buffered pipeline blocks + resident scratch.  v7x has
    # only 64 MiB physical VMEM (vs 128 MiB on v5e/v6e), so derive an explicit
    # limit rather than relying on defaults (v5e's default scoped limit is 16 MiB).
    est = (2 * t_i * t_k * adj.dtype.itemsize
           + 2 * t_k * F_in * tgt.dtype.itemsize
           + 2 * t_i * F_out * jnp.dtype(out_dtype).itemsize
           + 2 * F_in * F_out * w.dtype.itemsize
           + (n_p * F_out * 4 if cache_support else 0)
           + (t_i * F_out * 4 if not acc_in_out else 0))
    vmem_limit = min(max(int(est * 1.5) + (4 << 20), 32 << 20), 64 << 20)

    # The support cache is per-TensorCore state filled during the i == 0 sweep,
    # so keep the i axis on one core ("arbitrary") when caching; the batch axis
    # is always safe to shard across v7x's two TensorCores.
    if cache_support:
        dim_sem = ("parallel", "arbitrary", "arbitrary")
    else:
        dim_sem = ("parallel", "parallel", "arbitrary")

    kernel = functools.partial(
        _crossgnn_kernel, t_k=t_k, n_valid=n_node, mask_k=mask_k,
        cache_support=cache_support, acc_in_out=acc_in_out)

    out = pl.pallas_call(
        kernel,
        out_shape=jax.ShapeDtypeStruct((B, n_node, F_out), out_dtype),
        grid_spec=pltpu.PrefetchScalarGridSpec(
            num_scalar_prefetch=0,
            grid=grid,
            in_specs=[
                pl.BlockSpec((None, t_k, F_in), tgt_index),
                pl.BlockSpec((None, t_i, t_k), lambda b, i, k: (b, i, k)),
                # weight is grid-invariant: constant block index -> single DMA.
                pl.BlockSpec((F_in, F_out), lambda b, i, k: (0, 0)),
            ],
            out_specs=pl.BlockSpec((None, t_i, F_out), lambda b, i, k: (b, i, 0)),
            scratch_shapes=scratch_shapes,
        ),
        compiler_params=pltpu.CompilerParams(
            dimension_semantics=dim_sem,
            vmem_limit_bytes=vmem_limit),
    )(tgt, adj, w)

    if n_node != N:
        out = out[:, :N, :]
    return out


def xavier_uniform(key, fan_in, fan_out, dtype=jnp.float32):
    # Matches torch.nn.init.xavier_uniform_ with gain=1.
    bound = (6.0 / (fan_in + fan_out)) ** 0.5
    return jax.random.uniform(key, (fan_in, fan_out), dtype=dtype,
                              minval=-bound, maxval=bound)


if __name__ == "__main__":
    key = jax.random.PRNGKey(0)
    k_w, k_tgt, k_adj = jax.random.split(key, 3)

    B, N = 2, 16            # batch, number of graph nodes
    F_in, F_out = 64, 128   # lane-dense F_out (multiple of 128)

    weight = xavier_uniform(k_w, F_in, F_out)
    tgt = jax.random.normal(k_tgt, (B, N, F_in), dtype=jnp.float32)
    adj = jax.random.uniform(k_adj, (B, N, N), dtype=jnp.float32)

    out = jax.block_until_ready(cross_gnn(tgt, adj, weight))

    # Reference check in plain JAX (same math as the PyTorch module).
    support_ref = jnp.matmul(tgt, weight, precision=jax.lax.Precision.HIGHEST)
    out_ref = jnp.matmul(adj * EDGE_WEIGHT, support_ref,
                         precision=jax.lax.Precision.HIGHEST)
    assert out.shape == (B, N, F_out)
    err = float(jnp.max(jnp.abs(out - out_ref)))
    # Kernel matmuls use Mosaic's default (near-f32) MXU precision; the
    # reference uses Precision.HIGHEST, so allow a slightly looser tolerance.
    assert jnp.allclose(out, out_ref, atol=1e-3, rtol=1e-3), err

    print("KERNEL_OK")
</pallas_src>

<mosaic_0001>
module attributes {stable_mosaic.version = 11 : i64} {
  func.func @_crossgnn_kernel(%arg0: i32, %arg1: i32, %arg2: i32, %arg3: memref<1x128x64xf32, #tpu.memory_space<vmem>>, %arg4: memref<1x128x128xf32, #tpu.memory_space<vmem>>, %arg5: memref<64x128xf32, #tpu.memory_space<vmem>>, %arg6: memref<1x128x128xf32, #tpu.memory_space<vmem>>) attributes {dimension_semantics = [#tpu.dimension_semantics<parallel>, #tpu.dimension_semantics<parallel>, #tpu.dimension_semantics<arbitrary>], iteration_bounds = array<i64: 2, 1, 1>, scalar_prefetch = 0 : i64, scratch_operands = 0 : i64, tpu.core_type = #tpu.core_type<tc>, window_params = [{transform_indices = @transform_0, window_bounds = array<i64: 1, 128, 64>}, {transform_indices = @transform_1, window_bounds = array<i64: 1, 128, 128>}, {pipeline_mode = #tpu.pipeline_mode<synchronous>, transform_indices = @transform_2, window_bounds = array<i64: 64, 128>}, {transform_indices = @transform_3, window_bounds = array<i64: 1, 128, 128>}]} {
    %c0 = arith.constant 0 : index
    %c0_0 = arith.constant 0 : index
    %c0_1 = arith.constant 0 : index
    %0 = vector.load %arg3[%c0, %c0_0, %c0_1] : memref<1x128x64xf32, #tpu.memory_space<vmem>>, vector<1x128x64xf32>
    %1 = vector.shape_cast %0 : vector<1x128x64xf32> to vector<128x64xf32>
    %c0_2 = arith.constant 0 : index
    %c0_3 = arith.constant 0 : index
    %2 = vector.load %arg5[%c0_2, %c0_3] : memref<64x128xf32, #tpu.memory_space<vmem>>, vector<64x128xf32>
    %cst = arith.constant dense<0.000000e+00> : vector<128x128xf32>
    %3 = tpu.matmul %1, %2, %cst {dimension_numbers = #tpu.dot_dimension_numbers<[1], [0], [0], [1], [0, 0, 1, 1], [], []>} : vector<128x64xf32>, vector<64x128xf32>, vector<128x128xf32> -> vector<128x128xf32>
    %c0_4 = arith.constant 0 : index
    %c0_5 = arith.constant 0 : index
    %c0_6 = arith.constant 0 : index
    %4 = vector.load %arg4[%c0_4, %c0_5, %c0_6] : memref<1x128x128xf32, #tpu.memory_space<vmem>>, vector<1x128x128xf32>
    %5 = vector.shape_cast %4 : vector<1x128x128xf32> to vector<128x128xf32>
    %c0_i32 = arith.constant 0 : i32
    %6 = arith.cmpi eq, %arg2, %c0_i32 : i32
    %7 = arith.extui %6 : i1 to i32
    %c0_i32_7 = arith.constant 0 : i32
    %8 = arith.cmpi ne, %7, %c0_i32_7 : i32
    scf.if %8 {
      %cst_15 = arith.constant 0.000000e+00 : f32
      %16 = vector.broadcast %cst_15 : f32 to vector<128x128xf32>
      %c0_16 = arith.constant 0 : index
      %c0_17 = arith.constant 0 : index
      %c0_18 = arith.constant 0 : index
      %17 = vector.load %arg6[%c0_16, %c0_17, %c0_18] : memref<1x128x128xf32, #tpu.memory_space<vmem>>, vector<1x128x128xf32>
      %18 = vector.shape_cast %17 : vector<1x128x128xf32> to vector<128x128xf32>
      %19 = vector.shape_cast %16 : vector<128x128xf32> to vector<1x128x128xf32>
      tpu.vector_store %arg6[%c0_16, %c0_17, %c0_18], %19 {strides = array<i32>} : memref<1x128x128xf32, #tpu.memory_space<vmem>>, vector<1x128x128xf32>,
    } else {
    }
    %c0_8 = arith.constant 0 : index
    %c0_9 = arith.constant 0 : index
    %c0_10 = arith.constant 0 : index
    %9 = vector.load %arg6[%c0_8, %c0_9, %c0_10] : memref<1x128x128xf32, #tpu.memory_space<vmem>>, vector<1x128x128xf32>
    %10 = vector.shape_cast %9 : vector<1x128x128xf32> to vector<128x128xf32>
    %cst_11 = arith.constant dense<0.000000e+00> : vector<128x128xf32>
    %11 = tpu.matmul %5, %3, %cst_11 {dimension_numbers = #tpu.dot_dimension_numbers<[1], [0], [0], [1], [0, 0, 1, 1], [], []>} : vector<128x128xf32>, vector<128x128xf32>, vector<128x128xf32> -> vector<128x128xf32>
    %12 = arith.addf %10, %11 : vector<128x128xf32>
    %c0_12 = arith.constant 0 : index
    %c0_13 = arith.constant 0 : index
    %c0_14 = arith.constant 0 : index
    %13 = vector.load %arg6[%c0_12, %c0_13, %c0_14] : memref<1x128x128xf32, #tpu.memory_space<vmem>>, vector<1x128x128xf32>
    %14 = vector.shape_cast %13 : vector<1x128x128xf32> to vector<128x128xf32>
    %15 = vector.shape_cast %12 : vector<128x128xf32> to vector<1x128x128xf32>
    tpu.vector_store %arg6[%c0_12, %c0_13, %c0_14], %15 {strides = array<i32>} : memref<1x128x128xf32, #tpu.memory_space<vmem>>, vector<1x128x128xf32>,
    return
  }
  func.func @transform_0(%arg0: i32, %arg1: i32, %arg2: i32) -> (i32, i32, i32) {
    %c0_i32 = arith.constant 0 : i32
    %c0_i32_0 = arith.constant 0 : i32
    return %arg0, %arg2, %c0_i32 : i32, i32, i32
  }
  func.func @transform_1(%arg0: i32, %arg1: i32, %arg2: i32) -> (i32, i32, i32) {
    %c0_i32 = arith.constant 0 : i32
    return %arg0, %arg1, %arg2 : i32, i32, i32
  }
  func.func @transform_2(%arg0: i32, %arg1: i32, %arg2: i32) -> (i32, i32) {
    %c0_i32 = arith.constant 0 : i32
    %c0_i32_0 = arith.constant 0 : i32
    %c0_i32_1 = arith.constant 0 : i32
    return %c0_i32, %c0_i32_0 : i32, i32
  }
  func.func @transform_3(%arg0: i32, %arg1: i32, %arg2: i32) -> (i32, i32, i32) {
    %c0_i32 = arith.constant 0 : i32
    %c0_i32_0 = arith.constant 0 : i32
    return %arg0, %arg1, %c0_i32 : i32, i32, i32
  }
}

</mosaic_0001>

<bundles_post_ra>
// kernel: tpu_custom_call.1
= control target key start
LH: loop header
LB: loop body
LE: loop exit
PB: predicated region body
PF: predicated region fallthrough
CT: control target
= control target key end

     0   :  { %8 = vsyncpa [#allocation3], 0  ;;  %s1444_s0 = inlined_call_operand.vmem [shape: f32[2,128,64], index: 0, kind: input, shape index: {}]   ;;  %s1445_s1 = inlined_call_operand.vmem [shape: f32[2,128,128], index: 1, kind: input, shape index: {}]   ;;  %s1446_s2 = inlined_call_operand.vmem [shape: f32[64,128], index: 2, kind: input, shape index: {}]   ;;  %s1447_s3 = inlined_call_operand.hbm [shape: f32[2,128,128], index: 3, kind: output, shape index: {}]  }
   0x1   :  { %10 = vsyncpa [#allocation3 + $0x1], 0  ;;  %s1197_s12 = smov 0   ;;  %s1199_s13 = smov 0  }
   0x2   :  { %s1201_s14 = smov 0   ;;  %s1203_s15 = smov 0  }
   0x3   :  { %s1205_s16 = smov 0   ;;  %s1207_s17 = smov 0  }
   0x4 LB: > { %s820_s18 = sadd.s32 4294967295, %s1172_s17   ;;  %s821_s19 = sadd.s32 4294967294, %s1172_s17   ;;  %s1172_s17 = sphi %s1207_s17, %s16_s17   ;;  %s1168_s16 = sphi %s1205_s16, %s1454_s16   ;;  %s1164_s15 = sphi %s1203_s15, %s1453_s15   ;;  %s1160_s14 = sphi %s1201_s14, %s1452_s14   ;;  %s1156_s13 = sphi %s1199_s13, %s1451_s13   ;;  %s1152_s12 = sphi %s1197_s12, %s1450_s12  }
   0x5   : > { %s35_s20 = sadd.s32 1, %s1168_s16  ;;  %s123_s21 = sadd.s32 1, %s1160_s14 }
   0x6   : > { %p37_p0 = scmp.ge.s32.totalorder %s35_s20, 2  ;;  %p133_p1 = scmp.ne.s32.totalorder %s1160_s14, %s1156_s13 }
   0x7   : > { %p134_p2 = scmp.eq.s32.totalorder %s820_s18, 1  ;;  %p139_p3 = scmp.ne.s32.totalorder %s1156_s13, %s1152_s12 }
   0x8   : > { %s1456_s20 = smov (%p37_p0, %s35_s20), 0  ;;  %p140_p5 = scmp.eq.s32.totalorder %s821_s19, 1 }
   0x9   : > { %p1237_p4 = por %p134_p2, %p133_p1  ;;  %s118_s23 = ssub.s32 %s1168_s16, %s1456_s20 }
   0xa   : > { %p824_p6 = scmp.ge.s32.totalorder %s1172_s17, 1  ;;  %p121_p7 = scmp.eq.s32.totalorder %s118_s23, 0 }
   0xb   : > { %p1244_p8 = por %p140_p5, %p139_p3  ;;  %p190_p9 = scmp.lt.s32.totalorder %s1172_s17, 3 }
   0xc   : > { %s1250_s25 = scalar_select %p121_p7, %s1160_s14, %s123_s21  }
   0xd   : > { %p191_p10 = pnand %p824_p6, %p190_p9 }
   0xe   : > { %p231_p11 = scmp.lt.s32.totalorder (!%p191_p10), %s1164_s15, 1  ;;  %s853_s9 = sshll.u32 (!%p191_p10), %s1164_s15, 11 }
   0xf   : > { %194 = sbr.rel (%p191_p10) target bundleno = 519 (0x207), region = 32  ;;  %s1391_s19 = scalar_lea.hbm (!%p191_p10), %s1447_s3, %s853_s9 }
  0x10   : > { %s1174_s23 = smov (!%p191_p10), [#allocation2]  }
  0x11   : > { %s1100_s26 = sshll.u32 (!%p191_p10), %s1174_s23, 4  ;;  %s1101_s26 = int_to_ptr.vmem [resolvable:$false] %s1100_s26 }
  0x12   : > { %s1102_s27 = scalar_lea.vmem (!%p191_p10), %s1101_s26, 4096 }
  0x14   : > { %v277_v0 = vld [vmem:[%s1446_s2 + $0x38] sm:$0xff]  ;;  %v276_v1 = vld [vmem:[%s1446_s2 + $0x30] sm:$0xff]  ;;  %v275_v2 = vld [vmem:[%s1446_s2 + $0x28] sm:$0xff]  ;;  %s1263_s5 = scalar_select %p231_p11, %s1164_s15, 1  ;;  %vm278_vm0 = vcmask 523264  }
  0x15   : > { %910 = vmatprep.subr.mxu0 %v277_v0  ;;  %v274_v3 = vld [vmem:[%s1446_s2 + $0x20] sm:$0xff]  ;;  %v273_v4 = vld [vmem:[%s1446_s2 + $0x18] sm:$0xff]  ;;  %v272_v6 = vld [vmem:[%s1446_s2 + $0x10] sm:$0xff] }
  0x16   : > { %911 = vmatpush3.msra.mxu0 %v277_v0  ;;  %s851_s8 = sshll.u32 %s1263_s5, 7  ;;  %v271_v7 = vld [vmem:[%s1446_s2 + $0x8] sm:$0xff]  ;;  %v270_v8 = vld [vmem:[%s1446_s2] sm:$0xff]  ;;  %s227_s5 = sand.u32 1, %s1156_s13  }
  0x17   : > { %912 = vmatprep.subr.mxu0 %v276_v1  ;;  %s1274_s11 = scalar_lea.vmem %s1444_s0, %s851_s8  ;;  %s1325_s6 = scalar_lea.vmem %s1445_s1, %s851_s8 }
  0x18   : > { %913 = vmatpush3.msra.mxu0 %v276_v1  ;;  %v254_v5 = vld [vmem:[%s1274_s11] sm:$0xff]  ;;  %v255_v9 = vld [vmem:[%s1274_s11 + $0x8] sm:$0xff]  ;;  %v256_v10 = vld [vmem:[%s1274_s11 + $0x10] sm:$0xff]  ;;  %s825_s7 = sshll.u32 %s227_s5, 7  ;;  %s1399_s21 = scalar_lea.sflag [#allocation3], %s227_s5 }
  0x19   : > { %914 = vmatprep.subr.mxu0 %v275_v2  ;;  %926 = vmatprep.mubr.msk.f32.mxu0 %vm278_vm0, %v254_v5  ;;  %v257_v11 = vld [vmem:[%s1274_s11 + $0x18] sm:$0xff]  ;;  %v258_v12 = vld [vmem:[%s1274_s11 + $0x20] sm:$0xff]  ;;  %v259_v13 = vld [vmem:[%s1274_s11 + $0x28] sm:$0xff]  ;;  %s1370_s8 = scalar_lea.vmem [#allocation2], %s825_s7 }
  0x1a   : > { %915 = vmatpush3.msra.mxu0 %v275_v2  ;;  %v260_v14 = vld [vmem:[%s1274_s11 + $0x30] sm:$0xff]  ;;  %v261_v15 = vld [vmem:[%s1274_s11 + $0x38] sm:$0xff]  ;;  %v262_v16 = vld [vmem:[%s1274_s11 + $0x40] sm:$0xff]  ;;  %s717_s10 = sshll.u32 %s1370_s8, 4  ;;  %s1393_s10 = int_to_ptr.vmem [resolvable:$true] %s717_s10 }
  0x1b   : > { %916 = vmatprep.subr.mxu0 %v274_v3  ;;  %v263_v17 = vld [vmem:[%s1274_s11 + $0x48] sm:$0xff]  ;;  %v264_v18 = vld [vmem:[%s1274_s11 + $0x50] sm:$0xff]  ;;  %v265_v19 = vld [vmem:[%s1274_s11 + $0x58] sm:$0xff]  ;;  %s1096_s15 = scalar_lea.vmem %s1393_s10, 2048  ;;  %p1103_p1 = scmp.lt.s32.totalorder %s1393_s10, %s1101_s26 }
  0x1c   : > { %917 = vmatpush3.msra.mxu0 %v274_v3  ;;  %v266_v20 = vld [vmem:[%s1274_s11 + $0x60] sm:$0xff]  ;;  %v267_v21 = vld [vmem:[%s1274_s11 + $0x68] sm:$0xff]  ;;  %v268_v22 = vld [vmem:[%s1274_s11 + $0x70] sm:$0xff]  ;;  %p1097_p12 = scmp.ne.s32.totalorder %s1393_s10, %s1096_s15  ;;  %p1104_p2 = scmp.lt.s32.totalorder %s1102_s27, %s1096_s15 }
  0x1d   : > { %918 = vmatprep.subr.mxu0 %v273_v4  ;;  %v269_v23 = vld [vmem:[%s1274_s11 + $0x78] sm:$0xff]  ;;  %v476_v24 = vld [vmem:[%s1325_s6 + $0x20] sm:$0xff]  ;;  %v477_v42 = vld [vmem:[%s1325_s6 + $0x28] sm:$0xff] }
  0x1e   : > { %919 = vmatpush3.msra.mxu0 %v273_v4  ;;  %988 = vmatprep.mubr.f32.mxu1 %v476_v24  ;;  %v472_v25 = vld [vmem:[%s1325_s6] sm:$0xff]  ;;  %v473_v43 = vld [vmem:[%s1325_s6 + $0x8] sm:$0xff]  ;;  %v478_v44 = vld [vmem:[%s1325_s6 + $0x30] sm:$0xff]  ;;  %p1098_p13 = pnand %p1097_p12, %p1237_p4  ;;  %p1105_p3 = por %p1104_p2, %p1103_p1 }
  0x1f   : > { %920 = vmatprep.subr.mxu0 %v272_v6  ;;  %v474_v45 = vld [vmem:[%s1325_s6 + $0x10] sm:$0xff]  ;;  %v479_v46 = vld [vmem:[%s1325_s6 + $0x38] sm:$0xff]  ;;  %v480_v48 = vld [vmem:[%s1325_s6 + $0x40] sm:$0xff] }
  0x20   : > { %921 = vmatpush3.msra.mxu0 %v272_v6  ;;  %v475_v47 = vld [vmem:[%s1325_s6 + $0x18] sm:$0xff]  ;;  %v481_v49 = vld [vmem:[%s1325_s6 + $0x48] sm:$0xff]  ;;  %v482_v50 = vld [vmem:[%s1325_s6 + $0x50] sm:$0xff]  ;;  %p1099_p0 = pneg %p1098_p13 }
  0x21   : > { %922 = vmatprep.subr.mxu0 %v271_v7  ;;  %v483_v51 = vld [vmem:[%s1325_s6 + $0x58] sm:$0xff]  ;;  %v484_v52 = vld [vmem:[%s1325_s6 + $0x60] sm:$0xff]  ;;  %v485_v53 = vld [vmem:[%s1325_s6 + $0x68] sm:$0xff] }
  0x22   : > { %923 = vmatpush3.msra.mxu0 %v271_v7  ;;  %v486_v54 = vld [vmem:[%s1325_s6 + $0x70] sm:$0xff]  ;;  %v487_v55 = vld [vmem:[%s1325_s6 + $0x78] sm:$0xff]  ;;  %p1106_p5 = pnand %p1105_p3, %p1099_p0 }
  0x23   : > { %924 = vmatprep.subr.mxu0 %v270_v8 }
  0x24   : > { %925 = vmatpush3.msra.mxu0 %v270_v8 }
  0x25   : > { %927 = vmatmul.mubr.msk.f32.vlgmr.msra.gmra.mxu0 %vm278_vm0, %v255_v9 }
  0x26   : > { %929 = vmatprep.mubr.msk.f32.mxu0 %vm278_vm0, %v256_v10 }
  0x29   : > { %930 = vmatmul.mubr.msk.f32.gmra.mxu0 %vm278_vm0, %v257_v11 }
  0x2a   : > { %932 = vmatprep.mubr.msk.f32.mxu0 %vm278_vm0, %v258_v12 }
  0x2d   : > { %933 = vmatmul.mubr.msk.f32.gmra.mxu0 %vm278_vm0, %v259_v13 }
  0x2e   : > { %935 = vmatprep.mubr.msk.f32.mxu0 %vm278_vm0, %v260_v14 }
  0x31   : > { %936 = vmatmul.mubr.msk.f32.gmra.mxu0 %vm278_vm0, %v261_v15 }
  0x32   : > { %938 = vmatprep.mubr.msk.f32.mxu0 %vm278_vm0, %v262_v16 }
  0x35   : > { %939 = vmatmul.mubr.msk.f32.gmra.mxu0 %vm278_vm0, %v263_v17 }
  0x36   : > { %941 = vmatprep.mubr.msk.f32.mxu0 %vm278_vm0, %v264_v18 }
  0x39   : > { %942 = vmatmul.mubr.msk.f32.gmra.mxu0 %vm278_vm0, %v265_v19 }
  0x3a   : > { %944 = vmatprep.mubr.msk.f32.mxu0 %vm278_vm0, %v266_v20 }
  0x3d   : > { %945 = vmatmul.mubr.msk.f32.gmra.mxu0 %vm278_vm0, %v267_v21 }
  0x3e   : > { %947 = vmatprep.mubr.msk.f32.mxu0 %vm278_vm0, %v268_v22 }
  0x41   : > { %948 = vmatmul.mubr.msk.f32.gmra.mxu0 %vm278_vm0, %v269_v23 }
  0x42   : > { %982 = vmatprep.mubr.f32.mxu0 %v472_v25 }
  0xe5   : > { %v1329_v26 = vpop.f32.mrf.mxu0 }
  0xe7   : > { %v1331_v27 = vpop.f32.mrf.mxu0 }
  0xe9   : > { %v1333_v28 = vpop.f32.mrf.mxu0 }
  0xeb   : > { %v1335_v29 = vpop.f32.mrf.mxu0 }
  0xed   : > { %v934_v30 = vpop.f32.mrf.mxu0 }
  0xef   : > { %v413_v31 = vpop.f32.mrf.mxu0 }
  0xf1   : > { %v937_v32 = vpop.f32.mrf.mxu0 }
  0xf3   : > { %v423_v33 = vpop.f32.mrf.mxu0 }
  0xf5   : > { %v940_v34 = vpop.f32.mrf.mxu0 }
  0xf7   : > { %v433_v35 = vpop.f32.mrf.mxu0 }
  0xf9   : > { %v943_v36 = vpop.f32.mrf.mxu0 }
  0xfb   : > { %v443_v37 = vpop.f32.mrf.mxu0 }
  0xfd   : > { %v946_v38 = vpop.f32.mrf.mxu0 }
  0xff   : > { %v453_v39 = vpop.f32.mrf.mxu0 }
 0x101   : > { %v949_v40 = vpop.f32.mrf.mxu0 }
 0x102   : > { %950 = vmatprep.subr.mxu0 %v949_v40  ;;  %1006 = vmatprep.subr.mxu1 %v949_v40 }
 0x103   : > { %v463_v41 = vpop.f32.mrf.mxu0  ;;  %951 = vmatpush3.msra.mxu0 %v949_v40  ;;  %1022 = vmatpush3.msra.mxu1 %v949_v40 }
 0x104   : > { %952 = vmatprep.subr.mxu0 %v463_v41  ;;  %1007 = vmatprep.subr.mxu1 %v463_v41 }
 0x105   : > { %953 = vmatpush3.msra.mxu0 %v463_v41  ;;  %1023 = vmatpush3.msra.mxu1 %v463_v41 }
 0x106   : > { %954 = vmatprep.subr.mxu0 %v946_v38  ;;  %1008 = vmatprep.subr.mxu1 %v946_v38 }
 0x107   : > { %955 = vmatpush3.msra.mxu0 %v946_v38  ;;  %1024 = vmatpush3.msra.mxu1 %v946_v38 }
 0x108   : > { %956 = vmatprep.subr.mxu0 %v453_v39  ;;  %1009 = vmatprep.subr.mxu1 %v453_v39 }
 0x109   : > { %957 = vmatpush3.msra.mxu0 %v453_v39  ;;  %1025 = vmatpush3.msra.mxu1 %v453_v39 }
 0x10a   : > { %958 = vmatprep.subr.mxu0 %v943_v36  ;;  %1010 = vmatprep.subr.mxu1 %v943_v36 }
 0x10b   : > { %959 = vmatpush3.msra.mxu0 %v943_v36  ;;  %1026 = vmatpush3.msra.mxu1 %v943_v36 }
 0x10c   : > { %960 = vmatprep.subr.mxu0 %v443_v37  ;;  %1011 = vmatprep.subr.mxu1 %v443_v37 }
 0x10d   : > { %961 = vmatpush3.msra.mxu0 %v443_v37  ;;  %1027 = vmatpush3.msra.mxu1 %v443_v37 }
 0x10e   : > { %962 = vmatprep.subr.mxu0 %v940_v34  ;;  %1012 = vmatprep.subr.mxu1 %v940_v34 }
 0x10f   : > { %963 = vmatpush3.msra.mxu0 %v940_v34  ;;  %1028 = vmatpush3.msra.mxu1 %v940_v34 }
 0x110   : > { %964 = vmatprep.subr.mxu0 %v433_v35  ;;  %1013 = vmatprep.subr.mxu1 %v433_v35 }
 0x111   : > { %965 = vmatpush3.msra.mxu0 %v433_v35  ;;  %1029 = vmatpush3.msra.mxu1 %v433_v35 }
 0x112   : > { %966 = vmatprep.subr.mxu0 %v937_v32  ;;  %1014 = vmatprep.subr.mxu1 %v937_v32 }
 0x113   : > { %967 = vmatpush3.msra.mxu0 %v937_v32  ;;  %1030 = vmatpush3.msra.mxu1 %v937_v32 }
 0x114   : > { %968 = vmatprep.subr.mxu0 %v423_v33  ;;  %1015 = vmatprep.subr.mxu1 %v423_v33 }
 0x115   : > { %969 = vmatpush3.msra.mxu0 %v423_v33  ;;  %1031 = vmatpush3.msra.mxu1 %v423_v33 }
 0x116   : > { %970 = vmatprep.subr.mxu0 %v934_v30  ;;  %1016 = vmatprep.subr.mxu1 %v934_v30 }
 0x117   : > { %971 = vmatpush3.msra.mxu0 %v934_v30  ;;  %1032 = vmatpush3.msra.mxu1 %v934_v30 }
 0x118   : > { %972 = vmatprep.subr.mxu0 %v413_v31  ;;  %1017 = vmatprep.subr.mxu1 %v413_v31 }
 0x119   : > { %973 = vmatpush3.msra.mxu0 %v413_v31  ;;  %1033 = vmatpush3.msra.mxu1 %v413_v31 }
 0x11a   : > { %974 = vmatprep.subr.mxu0 %v1333_v28  ;;  %1018 = vmatprep.subr.mxu1 %v1333_v28 }
 0x11b   : > { %975 = vmatpush3.msra.mxu0 %v1333_v28  ;;  %1034 = vmatpush3.msra.mxu1 %v1333_v28 }
 0x11c   : > { %976 = vmatprep.subr.mxu0 %v1335_v29  ;;  %1019 = vmatprep.subr.mxu1 %v1335_v29 }
 0x11d   : > { %977 = vmatpush3.msra.mxu0 %v1335_v29  ;;  %1035 = vmatpush3.msra.mxu1 %v1335_v29 }
 0x11e   : > { %978 = vmatprep.subr.mxu0 %v1329_v26  ;;  %1020 = vmatprep.subr.mxu1 %v1329_v26 }
 0x11f   : > { %979 = vmatpush3.msra.mxu0 %v1329_v26  ;;  %1036 = vmatpush3.msra.mxu1 %v1329_v26 }
 0x120   : > { %980 = vmatprep.subr.mxu0 %v1331_v27  ;;  %1021 = vmatprep.subr.mxu1 %v1331_v27 }
 0x121   : > { %981 = vmatpush3.msra.mxu0 %v1331_v27  ;;  %1037 = vmatpush3.msra.mxu1 %v1331_v27 }
 0x122   : > { %989 = vmatmul.mubr.f32.vlgmr.msra.gmra.mxu1 %v477_v42  ;;  %983 = vmatmul.mubr.f32.vlgmr.msra.gmra.mxu0 %v473_v43 }
 0x123   : > { %991 = vmatprep.mubr.f32.mxu1 %v478_v44  ;;  %985 = vmatprep.mubr.f32.mxu0 %v474_v45 }
 0x126   : > { %992 = vmatmul.mubr.f32.gmra.mxu1 %v479_v46  ;;  %986 = vmatmul.mubr.f32.gmra.mxu0 %v475_v47 }
 0x127   : > { %994 = vmatprep.mubr.f32.mxu1 %v480_v48 }
 0x12a   : > { %995 = vmatmul.mubr.f32.gmra.mxu1 %v481_v49 }
 0x12b   : > { %997 = vmatprep.mubr.f32.mxu1 %v482_v50 }
 0x12e   : > { %998 = vmatmul.mubr.f32.gmra.mxu1 %v483_v51 }
 0x12f   : > { %1000 = vmatprep.mubr.f32.mxu1 %v484_v52 }
 0x132   : > { %1001 = vmatmul.mubr.f32.gmra.mxu1 %v485_v53 }
 0x133   : > { %1003 = vmatprep.mubr.f32.mxu1 %v486_v54 }
 0x136   : > { %1004 = vmatmul.mubr.f32.gmra.mxu1 %v487_v55 }
 0x1e2   : > { %v990_v56 = vpop.f32.mrf.mxu1  ;;  %v984_v57 = vpop.f32.mrf.mxu0 }
 0x1e3   : > { %690 = vst [vmem:[%s1370_s8 + $0x28] sm:$0xff] %v990_v56  ;;  %686 = vst [vmem:[%s1370_s8 + $0x8] sm:$0xff] %v984_v57 }
 0x1e4   : > { %v610_v58 = vpop.f32.mrf.mxu1  ;;  %v590_v59 = vpop.f32.mrf.mxu0 }
 0x1e5   : > { %689 = vst [vmem:[%s1370_s8 + $0x20] sm:$0xff] %v610_v58  ;;  %685 = vst [vmem:[%s1370_s8] sm:$0xff] %v590_v59 }
 0x1e6   : > { %v993_v60 = vpop.f32.mrf.mxu1  ;;  %v987_v61 = vpop.f32.mrf.mxu0 }
 0x1e7   : > { %692 = vst [vmem:[%s1370_s8 + $0x38] sm:$0xff] %v993_v60  ;;  %688 = vst [vmem:[%s1370_s8 + $0x18] sm:$0xff] %v987_v61 }
 0x1e8   : > { %v620_v62 = vpop.f32.mrf.mxu1  ;;  %v600_v63 = vpop.f32.mrf.mxu0 }
 0x1e9   : > { %691 = vst [vmem:[%s1370_s8 + $0x30] sm:$0xff] %v620_v62  ;;  %687 = vst [vmem:[%s1370_s8 + $0x10] sm:$0xff] %v600_v63 }
 0x1ea   : > { %v996_v0 = vpop.f32.mrf.mxu1 }
 0x1eb   : > { %694 = vst [vmem:[%s1370_s8 + $0x48] sm:$0xff] %v996_v0 }
 0x1ec   : > { %v630_v1 = vpop.f32.mrf.mxu1 }
 0x1ed   : > { %693 = vst [vmem:[%s1370_s8 + $0x40] sm:$0xff] %v630_v1 }
 0x1ee   : > { %v999_v2 = vpop.f32.mrf.mxu1 }
 0x1ef   : > { %696 = vst [vmem:[%s1370_s8 + $0x58] sm:$0xff] %v999_v2 }
 0x1f0   : > { %v640_v3 = vpop.f32.mrf.mxu1 }
 0x1f1   : > { %695 = vst [vmem:[%s1370_s8 + $0x50] sm:$0xff] %v640_v3 }
 0x1f2   : > { %v1002_v4 = vpop.f32.mrf.mxu1 }
 0x1f3   : > { %698 = vst [vmem:[%s1370_s8 + $0x68] sm:$0xff] %v1002_v4 }
 0x1f4   : > { %v650_v5 = vpop.f32.mrf.mxu1 }
 0x1f5   : > { %697 = vst [vmem:[%s1370_s8 + $0x60] sm:$0xff] %v650_v5 }
 0x1f6   : > { %v1005_v6 = vpop.f32.mrf.mxu1 }
 0x1f7   : > { %700 = vst [vmem:[%s1370_s8 + $0x78] sm:$0xff] %v1005_v6 }
 0x1f8   : > { %v660_v7 = vpop.f32.mrf.mxu1 }
 0x1f9   : > { %699 = vst [vmem:[%s1370_s8 + $0x70] sm:$0xff] %v660_v7 }
 0x1fa   : > { %1109 = shalt.err (!%p1106_p5)
}
 0x1fb   : > { %s1110_s28 = scalar_lea.hbm %s1391_s19, 2048  ;;  %s1114_s4 = scalar_lea.hbm %s1447_s3, 4096 }
 0x1fc   : > { %p1111_p6 = scmp.ne.s32.totalorder %s1391_s19, %s1110_s28  ;;  %p1115_p10 = scmp.lt.s32.totalorder %s1391_s19, %s1447_s3 }
 0x1fd   : > { %p1116_p11 = scmp.lt.s32.totalorder %s1114_s4, %s1110_s28 }
 0x1fe   : > { %p1112_p7 = pnand %p1111_p6, %p1237_p4 }
 0x1ff   : > { %p1117_p12 = por %p1116_p11, %p1115_p10 }
 0x200   : > { %p1113_p9 = pneg %p1112_p7 }
 0x202   : > { %p1118_p13 = pnand %p1117_p12, %p1113_p9 }
 0x204   : > { %1121 = shalt.err (!%p1118_p13)
}
 0x205   : > { %s1175_s7 = smov 128   ;;  %s1176_s8 = smov 8  }
 0x206   : > { %1038 = dma.vmem_to_hbm [thread:$0]  (%p1237_p4), %s1393_s10, 2048, %s1391_s19, %s1399_s21, %s1175_s7, %s1175_s7, %s1176_s8  }
 0x207 PF: > { %p1044_p0 = scmp.ge.s32.totalorder %s1172_s17, 2  ;;  %s732_s9 = sand.u32 1, %s1152_s12  }
 0x208   : > { %s733_s11 = scalar_lea.sflag [#allocation3], %s732_s9 }
 0x209   : > { %p1041_p1 = pnand %p1044_p0, %p1244_p8 }
 0x20b   : > { %p1042_p2 = pneg %p1041_p1 }
 0x20d   : > { %1147 = dma.done.wait (%p1042_p2), %s733_s11, 2048  }
 0x20e   : > { %1149 = vsyncadd (%p1042_p2), %s733_s11, 4294965248  ;;  %s16_s17 = sadd.s32 1, %s1172_s17   ;;  %s1450_s12 = smov %s1156_s13 }
 0x20f   : > { %p13_p3 = scmp.ge.s32.totalorder %s16_s17, 4   ;;  %s1451_s13 = smov %s1160_s14 }
 0x210   : > { %s1452_s14 = smov %s1250_s25  ;;  %s1453_s15 = smov %s1168_s16 }
 0x211   : > { %s1454_s16 = smov %s1456_s20  ;;  %15 = sbr.rel (!%p13_p3) target bundleno = 4 (0x4), region = 74 }
 0x216   :  { %738 = vsyncpa [#allocation3], 1 }
 0x217   :  { %740 = vsyncpa [#allocation3 + $0x1], 1 }

</bundles_post_ra>
